<compile_context>
chip_gen: v5e
topology: v5e:2x2
jax: 0.10.0
libtpu: 0.0.40
codegen_flags: <defaults>
</compile_context>

<pallas_src>
import functools

import jax
import jax.numpy as jnp
from jax.experimental import pallas as pl
from jax.experimental.pallas import tpu as pltpu

_BN_EPS = 0.001
_HALO_ROWS = 8   # sublane-aligned row block used for the halo fetch


def _deconv_stats_kernel(x_ref, halo_ref, w_ref, y_ref, stats_ref):
    """One (batch, H-tile) step: stride-2 ConvTranspose2d + partial BN stats.

    x_ref    : (1, TH, W, Cin)     bf16 input rows [t*TH, (t+1)*TH)
    halo_ref : (1, 8,  W, Cin)     bf16 rows starting at (t+1)*TH (clamped)
    w_ref    : (4, Cin, 4*Cout)    bf16 tap-block weight per shifted copy
    y_ref    : (1, TH, W, 4*Cout)  bf16 parity-packed pre-BN output
    stats_ref: (1, 1, 2, 4*Cout)   f32  per-tile [sum, sum_sq]
    """
    _, th, w_dim, cin = x_ref.shape
    c4 = w_ref.shape[-1]

    x = x_ref[...].reshape(th, w_dim, cin)               # bf16, no in-kernel cast

    # Halo row = first input row of the next tile; zeroed at the true bottom
    # border (output_padding=1 => the last output row only receives the kh=2
    # taps, which is exactly what a zero halo produces).
    keep = jnp.where(pl.program_id(1) != pl.num_programs(1) - 1, 1.0, 0.0)
    halo = halo_ref[...].reshape(_HALO_ROWS, w_dim, cin)[0:1]
    halo = (halo.astype(jnp.float32) * keep).astype(x.dtype)

    # Extended (TH+1)-row buffer: the H-shift becomes a free major-dim slice.
    # A single W-shifted buffer is shared by both right-shifted operands.
    xe = jnp.concatenate([x, halo], axis=0)               # (TH+1, W, Cin)
    zcol = jnp.zeros((th + 1, 1, cin), x.dtype)
    xe_r = jnp.concatenate([xe[:, 1:], zcol], axis=1)     # x[., w+1], zero at W-1

    def mm(a, i):
        return jnp.dot(a.reshape(th * w_dim, cin), w_ref[i],
                       preferred_element_type=jnp.float32)

    # Four accumulated MXU matmuls (one per shifted copy) -> all four output
    # parities, lane-packed along the last dim.  f32 accumulation on the MXU.
    acc = mm(xe[:th], 0)           # x[h,   w  ]
    acc += mm(xe_r[:th], 1)        # x[h,   w+1]
    acc += mm(xe[1:], 2)           # x[h+1, w  ]
    acc += mm(xe_r[1:], 3)         # x[h+1, w+1]
    # (No conv bias: with training-mode BatchNorm it cancels exactly.)

    y_ref[...] = acc.reshape(1, th, w_dim, c4).astype(y_ref.dtype)

    # Partial BatchNorm statistics from the f32 accumulator (before bf16 cast).
    s = jnp.sum(acc, axis=0, keepdims=True)                # (1, 4*Cout)
    ss = jnp.sum(acc * acc, axis=0, keepdims=True)         # (1, 4*Cout)
    stats_ref[...] = jnp.concatenate([s, ss], axis=0).reshape(1, 1, 2, c4)


def upsampler_block_forward(x_nchw, params, *, tile_h=None,
                            matmul_dtype=jnp.bfloat16):
    """UpsamplerBlock forward: ConvTranspose2d(3, s=2, p=1, op=1) + BN + ReLU.

    x_nchw: (N, Cin, H, W) -> returns (N, Cout, 2H, 2W) float32.
    """
    wt = params["conv_weight"]      # (Cin, Cout, 3, 3)  torch layout
    gamma = params["bn_gamma"]      # (Cout,)
    beta = params["bn_beta"]        # (Cout,)
    # params["conv_bias"] is intentionally unused: with batch-statistics BN
    # the conv bias is absorbed into the batch mean and cancels exactly.

    n, cin, h, w_dim = x_nchw.shape
    cout = wt.shape[1]
    c4 = 4 * cout

    # TODO(synk): pad H/W to multiples of 8 when the incoming feature map
    # isn't already aligned (ERFNet resolutions are).
    assert h % _HALO_ROWS == 0 and w_dim % _HALO_ROWS == 0

    if tile_h is None:
        # Largest 8-aligned divisor of H up to 64 rows: amortizes grid-step
        # overhead and halo refetch while fitting the 32 MiB scoped-VMEM
        # budget (v7x has only 64 MiB physical VMEM).
        tile_h = _HALO_ROWS
        for cand in range(min(h, 64), _HALO_ROWS - 1, -_HALO_ROWS):
            if h % cand == 0:
                tile_h = cand
                break
    assert h % tile_h == 0 and tile_h % _HALO_ROWS == 0
    num_t = h // tile_h

    store_dtype = jnp.bfloat16 if matmul_dtype == jnp.bfloat16 else jnp.float32

    # NCHW -> NHWC (channels on lanes); cast once in the wrapper so the kernel
    # DMAs bf16 and the MXU operands need no per-tile casts.
    # TODO(synk): keep the surrounding network in NHWC to drop this transpose
    # and the final NHWC->NCHW boundary transpose entirely.
    x = jnp.transpose(x_nchw, (0, 2, 3, 1)).astype(matmul_dtype)

    # Tap-block weights per shifted copy [x, x_right, x_down, x_dr]; output
    # columns ordered by parity p = 2*dh + dw (ee, eo, oe, oo), so that
    # out[2h+dh, 2w+dw, c] = packed[h, w, p*Cout + c].
    m = lambda kh, kw: wt[:, :, kh, kw]                    # (Cin, Cout)
    z = jnp.zeros((cin, cout), wt.dtype)
    w4 = jnp.stack([
        jnp.concatenate([m(1, 1), m(1, 2), m(2, 1), m(2, 2)], axis=1),  # x
        jnp.concatenate([z,       m(1, 0), z,       m(2, 0)], axis=1),  # x_right
        jnp.concatenate([z,       z,       m(0, 1), m(0, 2)], axis=1),  # x_down
        jnp.concatenate([z,       z,       z,       m(0, 0)], axis=1),  # x_dr
    ], axis=0).astype(matmul_dtype)                        # (4, Cin, 4*Cout)

    y_packed, part = pl.pallas_call(
        _deconv_stats_kernel,
        grid=(n, num_t),
        in_specs=[
            pl.BlockSpec((1, tile_h, w_dim, cin), lambda b, t: (b, t, 0, 0)),
            pl.BlockSpec(
                (1, _HALO_ROWS, w_dim, cin),
                lambda b, t: (b,
                              jnp.minimum((t + 1) * (tile_h // _HALO_ROWS),
                                          h // _HALO_ROWS - 1),
                              0, 0)),
            pl.BlockSpec((4, cin, c4), lambda b, t: (0, 0, 0)),
        ],
        out_specs=(
            pl.BlockSpec((1, tile_h, w_dim, c4), lambda b, t: (b, t, 0, 0)),
            pl.BlockSpec((1, 1, 2, c4), lambda b, t: (b, t, 0, 0)),
        ),
        out_shape=(
            jax.ShapeDtypeStruct((n, h, w_dim, c4), store_dtype),
            jax.ShapeDtypeStruct((n, num_t, 2, c4), jnp.float32),
        ),
        compiler_params=pltpu.CompilerParams(
            dimension_semantics=("parallel", "parallel"),
            vmem_limit_bytes=32 * 1024 * 1024),
    )(x, x, w4)

    # Global BatchNorm statistics (training mode: biased variance, eps=1e-3);
    # fold the 4 parities back into per-Cout channels.
    sums = jnp.sum(part, axis=(0, 1)).reshape(2, 4, cout).sum(axis=1)
    count = jnp.float32(n * (2 * h) * (2 * w_dim))
    mean = sums[0] / count
    var = jnp.maximum(sums[1] / count - mean * mean, 0.0)
    scale = gamma * jax.lax.rsqrt(var + _BN_EPS)
    shift = beta - mean * scale

    # BN apply + ReLU + depth-to-space + NCHW in ONE fused XLA epilogue pass
    # (single read of the bf16 packed intermediate, single write of the
    # final output), per the review's recommended fusion.
    y = y_packed.astype(jnp.float32).reshape(n, h, w_dim, 2, 2, cout)
    y = jnp.maximum(y * scale.reshape(1, 1, 1, 1, 1, cout)
                    + shift.reshape(1, 1, 1, 1, 1, cout), 0.0)
    o = jnp.transpose(y, (0, 5, 1, 3, 2, 4))               # (n, c, h, dh, w, dw)
    return o.reshape(n, cout, 2 * h, 2 * w_dim)


def init_params(key, ninput, noutput):
    """Deterministic synthetic parameters in PyTorch layouts.

    conv_weight is (Cin, Cout, 3, 3) -- the nn.ConvTranspose2d.weight layout.
    """
    k = jax.random.split(key, 4)
    return dict(
        conv_weight=0.1 * jax.random.normal(k[0], (ninput, noutput, 3, 3),
                                            jnp.float32),
        conv_bias=0.05 * jax.random.normal(k[1], (noutput,), jnp.float32),
        bn_gamma=1.0 + 0.1 * jax.random.normal(k[2], (noutput,), jnp.float32),
        bn_beta=0.05 * jax.random.normal(k[3], (noutput,), jnp.float32),
    )


def _reference(x_nchw, params):
    """Pure-XLA f32 reference: ConvTranspose2d == lhs-dilated conv with
    flipped, channel-transposed weights; BatchNorm (batch stats, eps=1e-3);
    ReLU.  Uses the conv bias (which must cancel through BN)."""
    wt = params["conv_weight"]
    w_conv = jnp.transpose(wt[:, :, ::-1, ::-1], (1, 0, 2, 3))  # (Cout,Cin,3,3)
    y = jax.lax.conv_general_dilated(
        x_nchw, w_conv, window_strides=(1, 1), padding=((1, 2), (1, 2)),
        lhs_dilation=(2, 2), rhs_dilation=(1, 1),
        dimension_numbers=("NCHW", "OIHW", "NCHW"),
        precision=jax.lax.Precision.HIGHEST)
    y = y + params["conv_bias"][None, :, None, None]
    mean = jnp.mean(y, axis=(0, 2, 3), keepdims=True)
    var = jnp.mean(jnp.square(y - mean), axis=(0, 2, 3), keepdims=True)
    g = params["bn_gamma"][None, :, None, None]
    b = params["bn_beta"][None, :, None, None]
    return jnp.maximum((y - mean) * g * jax.lax.rsqrt(var + _BN_EPS) + b, 0.0)


if __name__ == "__main__":
    key = jax.random.PRNGKey(0)
    kx, kp = jax.random.split(key)

    # Small UpsamplerBlock(ninput=16, noutput=8) on a 2x16x16x16 NCHW input.
    n, cin, cout, h, w = 2, 16, 8, 16, 16
    x = jax.random.normal(kx, (n, cin, h, w), jnp.float32)
    params = init_params(kp, cin, cout)

    fwd = jax.jit(upsampler_block_forward)
    out = fwd(x, params)
    jax.block_until_ready(out)
    assert out.shape == (n, cout, 2 * h, 2 * w) and out.dtype == jnp.float32

    ref = _reference(x, params)
    err = float(jnp.max(jnp.abs(out - ref)))
    # Tolerance loosened (review note): bf16 MXU matmul + bf16 packed
    # intermediate vs. an all-f32 HIGHEST-precision reference.
    assert err < 5e-2, f"mismatch vs XLA reference: max abs err = {err}"
    print("KERNEL_OK")
</pallas_src>

<mosaic_0001>
module attributes {stable_mosaic.version = 11 : i64} {
  func.func @_deconv_stats_kernel(%arg0: i32, %arg1: i32, %arg2: memref<1x16x16x16xbf16, #tpu.memory_space<vmem>>, %arg3: memref<1x8x16x16xbf16, #tpu.memory_space<vmem>>, %arg4: memref<4x16x32xbf16, #tpu.memory_space<vmem>>, %arg5: memref<1x16x16x32xbf16, #tpu.memory_space<vmem>>, %arg6: memref<1x1x2x32xf32, #tpu.memory_space<vmem>>) attributes {dimension_semantics = [#tpu.dimension_semantics<parallel>, #tpu.dimension_semantics<parallel>], iteration_bounds = array<i64: 2, 1>, scalar_prefetch = 0 : i64, scratch_operands = 0 : i64, tpu.core_type = #tpu.core_type<tc>, window_params = [{transform_indices = @transform_0, window_bounds = array<i64: 1, 16, 16, 16>}, {transform_indices = @transform_1, window_bounds = array<i64: 1, 8, 16, 16>}, {pipeline_mode = #tpu.pipeline_mode<synchronous>, transform_indices = @transform_2, window_bounds = array<i64: 4, 16, 32>}, {transform_indices = @transform_3, window_bounds = array<i64: 1, 16, 16, 32>}, {transform_indices = @transform_4, window_bounds = array<i64: 1, 1, 2, 32>}]} {
    %c0 = arith.constant 0 : index
    %c0_0 = arith.constant 0 : index
    %c0_1 = arith.constant 0 : index
    %c0_2 = arith.constant 0 : index
    %0 = vector.load %arg2[%c0, %c0_0, %c0_1, %c0_2] : memref<1x16x16x16xbf16, #tpu.memory_space<vmem>>, vector<1x16x16x16xbf16>
    %1 = vector.shape_cast %0 : vector<1x16x16x16xbf16> to vector<16x16x16xbf16>
    %c0_i32 = arith.constant 0 : i32
    %2 = arith.cmpi ne, %arg1, %c0_i32 : i32
    %cst = arith.constant 1.000000e+00 : f32
    %cst_3 = arith.constant 0.000000e+00 : f32
    %3 = arith.select %2, %cst, %cst_3 : f32
    %c0_4 = arith.constant 0 : index
    %c0_5 = arith.constant 0 : index
    %c0_6 = arith.constant 0 : index
    %c0_7 = arith.constant 0 : index
    %4 = vector.load %arg3[%c0_4, %c0_5, %c0_6, %c0_7] : memref<1x8x16x16xbf16, #tpu.memory_space<vmem>>, vector<1x8x16x16xbf16>
    %5 = vector.shape_cast %4 : vector<1x8x16x16xbf16> to vector<8x16x16xbf16>
    %6 = vector.extract_strided_slice %5 {offsets = [0, 0, 0], sizes = [1, 16, 16], strides = [1, 1, 1]} : vector<8x16x16xbf16> to vector<1x16x16xbf16>
    %7 = arith.extf %6 : vector<1x16x16xbf16> to vector<1x16x16xf32>
    %8 = vector.broadcast %3 : f32 to vector<1x16x16xf32>
    %9 = arith.mulf %7, %8 : vector<1x16x16xf32>
    %10 = arith.truncf %9 : vector<1x16x16xf32> to vector<1x16x16xbf16>
    %11 = tpu.concatenate %1, %10 in 0 : vector<16x16x16xbf16>, vector<1x16x16xbf16> -> vector<17x16x16xbf16>
    %cst_8 = arith.constant 0.000000e+00 : bf16
    %12 = vector.broadcast %cst_8 : bf16 to vector<17x1x16xbf16>
    %13 = vector.extract_strided_slice %11 {offsets = [0, 1, 0], sizes = [17, 15, 16], strides = [1, 1, 1]} : vector<17x16x16xbf16> to vector<17x15x16xbf16>
    %14 = tpu.concatenate %13, %12 in 1 : vector<17x15x16xbf16>, vector<17x1x16xbf16> -> vector<17x16x16xbf16>
    %15 = vector.extract_strided_slice %11 {offsets = [0, 0, 0], sizes = [16, 16, 16], strides = [1, 1, 1]} : vector<17x16x16xbf16> to vector<16x16x16xbf16>
    %16 = vector.shape_cast %15 : vector<16x16x16xbf16> to vector<256x16xbf16>
    %c0_9 = arith.constant 0 : index
    %c0_10 = arith.constant 0 : index
    %c0_11 = arith.constant 0 : index
    %17 = vector.load %arg4[%c0_9, %c0_10, %c0_11] : memref<4x16x32xbf16, #tpu.memory_space<vmem>>, vector<1x16x32xbf16>
    %18 = vector.shape_cast %17 : vector<1x16x32xbf16> to vector<16x32xbf16>
    %cst_12 = arith.constant dense<0.000000e+00> : vector<256x32xf32>
    %19 = tpu.matmul %16, %18, %cst_12 {dimension_numbers = #tpu.dot_dimension_numbers<[1], [0], [0], [1], [0, 0, 1, 1], [], []>} : vector<256x16xbf16>, vector<16x32xbf16>, vector<256x32xf32> -> vector<256x32xf32>
    %20 = vector.extract_strided_slice %14 {offsets = [0, 0, 0], sizes = [16, 16, 16], strides = [1, 1, 1]} : vector<17x16x16xbf16> to vector<16x16x16xbf16>
    %21 = vector.shape_cast %20 : vector<16x16x16xbf16> to vector<256x16xbf16>
    %c1 = arith.constant 1 : index
    %c0_13 = arith.constant 0 : index
    %c0_14 = arith.constant 0 : index
    %22 = vector.load %arg4[%c1, %c0_13, %c0_14] : memref<4x16x32xbf16, #tpu.memory_space<vmem>>, vector<1x16x32xbf16>
    %23 = vector.shape_cast %22 : vector<1x16x32xbf16> to vector<16x32xbf16>
    %cst_15 = arith.constant dense<0.000000e+00> : vector<256x32xf32>
    %24 = tpu.matmul %21, %23, %cst_15 {dimension_numbers = #tpu.dot_dimension_numbers<[1], [0], [0], [1], [0, 0, 1, 1], [], []>} : vector<256x16xbf16>, vector<16x32xbf16>, vector<256x32xf32> -> vector<256x32xf32>
    %25 = arith.addf %19, %24 : vector<256x32xf32>
    %26 = vector.extract_strided_slice %11 {offsets = [1, 0, 0], sizes = [16, 16, 16], strides = [1, 1, 1]} : vector<17x16x16xbf16> to vector<16x16x16xbf16>
    %27 = vector.shape_cast %26 : vector<16x16x16xbf16> to vector<256x16xbf16>
    %c2 = arith.constant 2 : index
    %c0_16 = arith.constant 0 : index
    %c0_17 = arith.constant 0 : index
    %28 = vector.load %arg4[%c2, %c0_16, %c0_17] : memref<4x16x32xbf16, #tpu.memory_space<vmem>>, vector<1x16x32xbf16>
    %29 = vector.shape_cast %28 : vector<1x16x32xbf16> to vector<16x32xbf16>
    %cst_18 = arith.constant dense<0.000000e+00> : vector<256x32xf32>
    %30 = tpu.matmul %27, %29, %cst_18 {dimension_numbers = #tpu.dot_dimension_numbers<[1], [0], [0], [1], [0, 0, 1, 1], [], []>} : vector<256x16xbf16>, vector<16x32xbf16>, vector<256x32xf32> -> vector<256x32xf32>
    %31 = arith.addf %25, %30 : vector<256x32xf32>
    %32 = vector.extract_strided_slice %14 {offsets = [1, 0, 0], sizes = [16, 16, 16], strides = [1, 1, 1]} : vector<17x16x16xbf16> to vector<16x16x16xbf16>
    %33 = vector.shape_cast %32 : vector<16x16x16xbf16> to vector<256x16xbf16>
    %c3 = arith.constant 3 : index
    %c0_19 = arith.constant 0 : index
    %c0_20 = arith.constant 0 : index
    %34 = vector.load %arg4[%c3, %c0_19, %c0_20] : memref<4x16x32xbf16, #tpu.memory_space<vmem>>, vector<1x16x32xbf16>
    %35 = vector.shape_cast %34 : vector<1x16x32xbf16> to vector<16x32xbf16>
    %cst_21 = arith.constant dense<0.000000e+00> : vector<256x32xf32>
    %36 = tpu.matmul %33, %35, %cst_21 {dimension_numbers = #tpu.dot_dimension_numbers<[1], [0], [0], [1], [0, 0, 1, 1], [], []>} : vector<256x16xbf16>, vector<16x32xbf16>, vector<256x32xf32> -> vector<256x32xf32>
    %37 = arith.addf %31, %36 : vector<256x32xf32>
    %38 = vector.shape_cast %37 : vector<256x32xf32> to vector<1x16x16x32xf32>
    %39 = arith.truncf %38 : vector<1x16x16x32xf32> to vector<1x16x16x32xbf16>
    %c0_22 = arith.constant 0 : index
    %c0_23 = arith.constant 0 : index
    %c0_24 = arith.constant 0 : index
    %c0_25 = arith.constant 0 : index
    %40 = vector.load %arg5[%c0_22, %c0_23, %c0_24, %c0_25] : memref<1x16x16x32xbf16, #tpu.memory_space<vmem>>, vector<1x16x16x32xbf16>
    tpu.vector_store %arg5[%c0_22, %c0_23, %c0_24, %c0_25], %39 {strides = array<i32>} : memref<1x16x16x32xbf16, #tpu.memory_space<vmem>>, vector<1x16x16x32xbf16>,
    %cst_26 = arith.constant dense<0.000000e+00> : vector<32xf32>
    %41 = vector.multi_reduction <add>, %37, %cst_26 [0] : vector<256x32xf32> to vector<32xf32>
    %42 = vector.shape_cast %41 : vector<32xf32> to vector<1x32xf32>
    %43 = arith.mulf %37, %37 : vector<256x32xf32>
    %cst_27 = arith.constant dense<0.000000e+00> : vector<32xf32>
    %44 = vector.multi_reduction <add>, %43, %cst_27 [0] : vector<256x32xf32> to vector<32xf32>
    %45 = vector.shape_cast %44 : vector<32xf32> to vector<1x32xf32>
    %46 = tpu.concatenate %42, %45 in 0 : vector<1x32xf32>, vector<1x32xf32> -> vector<2x32xf32>
    %47 = vector.shape_cast %46 : vector<2x32xf32> to vector<1x1x2x32xf32>
    %c0_28 = arith.constant 0 : index
    %c0_29 = arith.constant 0 : index
    %c0_30 = arith.constant 0 : index
    %c0_31 = arith.constant 0 : index
    %48 = vector.load %arg6[%c0_28, %c0_29, %c0_30, %c0_31] : memref<1x1x2x32xf32, #tpu.memory_space<vmem>>, vector<1x1x2x32xf32>
    tpu.vector_store %arg6[%c0_28, %c0_29, %c0_30, %c0_31], %47 {strides = array<i32>} : memref<1x1x2x32xf32, #tpu.memory_space<vmem>>, vector<1x1x2x32xf32>,
    return
  }
  func.func @transform_0(%arg0: i32, %arg1: i32) -> (i32, i32, i32, i32) {
    %c0_i32 = arith.constant 0 : i32
    %c0_i32_0 = arith.constant 0 : i32
    %c0_i32_1 = arith.constant 0 : i32
    return %arg0, %arg1, %c0_i32, %c0_i32_0 : i32, i32, i32, i32
  }
  func.func @transform_1(%arg0: i32, %arg1: i32) -> (i32, i32, i32, i32) {
    %c1_i32 = arith.constant 1 : i32
    %0 = arith.addi %arg1, %c1_i32 : i32
    %c2_i32 = arith.constant 2 : i32
    %1 = arith.muli %0, %c2_i32 : i32
    %c1_i32_0 = arith.constant 1 : i32
    %2 = arith.minsi %1, %c1_i32_0 : i32
    %c0_i32 = arith.constant 0 : i32
    %c0_i32_1 = arith.constant 0 : i32
    %c0_i32_2 = arith.constant 0 : i32
    return %arg0, %2, %c0_i32, %c0_i32_1 : i32, i32, i32, i32
  }
  func.func @transform_2(%arg0: i32, %arg1: i32) -> (i32, i32, i32) {
    %c0_i32 = arith.constant 0 : i32
    %c0_i32_0 = arith.constant 0 : i32
    %c0_i32_1 = arith.constant 0 : i32
    %c0_i32_2 = arith.constant 0 : i32
    return %c0_i32, %c0_i32_0, %c0_i32_1 : i32, i32, i32
  }
  func.func @transform_3(%arg0: i32, %arg1: i32) -> (i32, i32, i32, i32) {
    %c0_i32 = arith.constant 0 : i32
    %c0_i32_0 = arith.constant 0 : i32
    %c0_i32_1 = arith.constant 0 : i32
    return %arg0, %arg1, %c0_i32, %c0_i32_0 : i32, i32, i32, i32
  }
  func.func @transform_4(%arg0: i32, %arg1: i32) -> (i32, i32, i32, i32) {
    %c0_i32 = arith.constant 0 : i32
    %c0_i32_0 = arith.constant 0 : i32
    %c0_i32_1 = arith.constant 0 : i32
    return %arg0, %arg1, %c0_i32, %c0_i32_0 : i32, i32, i32, i32
  }
}

</mosaic_0001>

<bundles_post_ra>
// kernel: upsampler_block_forward.1
= control target key start
LH: loop header
LB: loop body
LE: loop exit
PB: predicated region body
PF: predicated region fallthrough
CT: control target
= control target key end

     0   :  { %s1818_s15 = smov 0   ;;  %s1820_s16 = smov 0   ;;  %s2178_s0 = inlined_call_operand.vmem [shape: bf16[2,16,16,16], index: 0, kind: input, shape index: {}, may-alias: {0,1}]   ;;  %s2179_s1 = inlined_call_operand.vmem [shape: bf16[2,16,16,16], index: 1, kind: input, shape index: {}, may-alias: {0,1}]   ;;  %s2180_s2 = inlined_call_operand.vmem [shape: bf16[4,16,32], index: 2, kind: input, shape index: {}]   ;;  %s2181_s3 = inlined_call_operand.vmem [shape: bf16[2,16,16,32], index: 3, kind: output, shape index: {0}]   ;;  %s2182_s4 = inlined_call_operand.vmem [shape: f32[2,1,2,32], index: 4, kind: output, shape index: {1}]  }
   0x1   :  { %s1822_s17 = smov 0  }
   0x2 LB: > { %s27_s18 = sadd.s32 1, %s1787_s16  ;;  %p1556_p0 = scmp.ge.s32.totalorder %s1791_s17, 1  ;;  %s1791_s17 = sphi %s1822_s17, %s15_s17   ;;  %s1787_s16 = sphi %s1820_s16, %s2186_s16   ;;  %s1783_s15 = sphi %s1818_s15, %s2185_s15  }
   0x3   : > { %p29_p1 = scmp.ge.s32.totalorder %s27_s18, 2  ;;  %p223_p2 = scmp.lt.s32.totalorder %s1791_s17, 3 }
   0x5   : > { %s2188_s18 = smov (%p29_p1, %s27_s18), 0  ;;  %p224_p3 = pnand %p1556_p0, %p223_p2 }
   0x6   : > { %p281_p4 = scmp.lt.s32.totalorder (!%p224_p3), %s1783_s15, 1 }
   0x7   : > { %227 = sbr.rel (%p224_p3) target bundleno = 424 (0x1a8), region = 32 }
   0xc   : > { %v1738_v0 = vld [vmem:[%s2180_s2 + $0x10] sm:$0xff]  ;;  %v1736_v1 = vld [vmem:[%s2180_s2] sm:$0xff]  ;;  %v1737_v2 = vld [vmem:[%s2180_s2 + $0x8] sm:$0xff]  ;;  %s2190_s15 = smov (!%p281_p4, %s1783_s15), 1  ;;  %vm624_vm0 = vcmask 130048   ;;  %vm593_vm1 = vcmask 1047552  }
   0xd   : > { %v1739_v3 = vld [vmem:[%s2180_s2 + $0x18] sm:$0xff]  ;;  %907 = vmatpush.bf16.msra.mxu2 %v1738_v0  ;;  %807 = vmatpush.bf16.msra.mxu1 %v1736_v1  ;;  %s1851_s27 = sshll.u32 %s2190_s15, 7  ;;  %vm594_vm2 = vsmask.f32 7424  ;;  %vm1186_vm4 = vcmask 257024   ;;  %vm1219_vm5 = vcmask 261120  }
   0xe   : > { %680 = vmatpush.bf16.msra.mxu0 %v1737_v2  ;;  %1040 = vmatpush.bf16.msra.mxu3 %v1739_v3  ;;  %s1857_s30 = scalar_lea.vmem %s2178_s0, %s1851_s27  ;;  %vm1863_vm3 = vmand %vm593_vm1, %vm594_vm2  ;;  %s1934_s7 = scalar_lea.vmem %s2181_s3, %s1851_s27  ;;  %vm1390_vm6 = vcmask 1040384   ;;  %vm1392_vm7 = vcmask 254976  }
   0xf   : > { %v1721_v4 = vld [vmem:[%s1857_s30 + $0x8] sm:$0xff]  ;;  %v1720_v5 = vld [vmem:[%s1857_s30] sm:$0xff]  ;;  %v1722_v15 = vld [vmem:[%s1857_s30 + $0x10] sm:$0xff]  ;;  %s1718_s8 = sadd.s32 64, %s1851_s27  ;;  %s1563_s12 = sshll.u32 %s2190_s15, 1 }
  0x10   : > { %1676 = vmatmul.msk.bf16.vlgmr.msra.gmra.mxu2 %vm624_vm0, %v1721_v4  ;;  %1654 = vmatmul.msk.bf16.vlgmr.msra.gmra.mxu1 %vm624_vm0, %v1720_v5  ;;  %v458_v6 = vshrl.u32 %v1720_v5, 16  ;;  %v460_v7 = vshll.u32 %v1720_v5, 16  ;;  %v465_v8 = vshrl.u32 %v1721_v4, 16  ;;  %v467_v9 = vshll.u32 %v1721_v4, 16  ;;  %v1723_v23 = vld [vmem:[%s1857_s30 + $0x18] sm:$0xff]  ;;  %v1724_v29 = vld [vmem:[%s1857_s30 + $0x20] sm:$0xff]  ;;  %s304_s11 = scalar_lea.vmem %s2179_s1, %s1718_s8  ;;  %s327_s19 = scalar_lea.vmem %s2182_s4, %s1563_s12 }
  0x11   : > { %v474_v18 = vshll.u32 %v1722_v15, 16  ;;  %v472_v19 = vshrl.u32 %v1722_v15, 16  ;;  %v481_v24 = vshll.u32 %v1723_v23, 16  ;;  %v479_v25 = vshrl.u32 %v1723_v23, 16  ;;  %v1725_v35 = vld [vmem:[%s1857_s30 + $0x28] sm:$0xff]  ;;  %v1726_v41 = vld [vmem:[%s1857_s30 + $0x30] sm:$0xff] }
  0x12   : > { %v462_v10 = vrot.slane %v460_v7, 1  ;;  %v469_v11 = vrot.slane %v467_v9, 1  ;;  %v488_v30 = vshll.u32 %v1724_v29, 16  ;;  %v486_v31 = vshrl.u32 %v1724_v29, 16  ;;  %v1727_v47 = vld [vmem:[%s1857_s30 + $0x38] sm:$0xff]  ;;  %v1728_v53 = vld [vmem:[%s1857_s30 + $0x40] sm:$0xff] }
  0x13   : > { %v476_v20 = vrot.slane %v474_v18, 1  ;;  %v483_v26 = vrot.slane %v481_v24, 1  ;;  %v495_v36 = vshll.u32 %v1725_v35, 16  ;;  %v493_v37 = vshrl.u32 %v1725_v35, 16  ;;  %v1729_v59 = vld [vmem:[%s1857_s30 + $0x48] sm:$0xff] }
  0x14   : > { %v463_v13 = vor.u32 %v462_v10, %v458_v6  ;;  %v470_v14 = vor.u32 %v469_v11, %v465_v8  ;;  %v490_v32 = vrot.slane %v488_v30, 1  ;;  %v502_v42 = vshll.u32 %v1726_v41, 16 }
  0x15   : > { %v477_v21 = vor.u32 %v476_v20, %v472_v19  ;;  %v484_v27 = vor.u32 %v483_v26, %v479_v25  ;;  %v497_v38 = vrot.slane %v495_v36, 1  ;;  %v500_v43 = vshrl.u32 %v1726_v41, 16 }
  0x16   : > { %v596_v16 = vsel %vm1863_vm3, %v463_v13, 0  ;;  %v597_v17 = vsel %vm1863_vm3, %v470_v14, 0  ;;  %v491_v33 = vor.u32 %v490_v32, %v486_v31  ;;  %v504_v44 = vrot.slane %v502_v42, 1 }
  0x17   : > { %1634 = vmatmul.msk.bf16.vlgmr.msra.gmra.mxu0 %vm624_vm0, %v596_v16  ;;  %1698 = vmatmul.msk.bf16.vlgmr.msra.gmra.mxu3 %vm624_vm0, %v597_v17  ;;  %v598_v22 = vsel %vm1863_vm3, %v477_v21, 0  ;;  %v599_v28 = vsel %vm1863_vm3, %v484_v27, 0  ;;  %v498_v39 = vor.u32 %v497_v38, %v493_v37  ;;  %v509_v48 = vshll.u32 %v1727_v47, 16 }
  0x18   : > { %v600_v34 = vsel %vm1863_vm3, %v491_v33, 0  ;;  %v505_v45 = vor.u32 %v504_v44, %v500_v43  ;;  %v507_v49 = vshrl.u32 %v1727_v47, 16  ;;  %v516_v54 = vshll.u32 %v1728_v53, 16 }
  0x19   : > { %v601_v40 = vsel %vm1863_vm3, %v498_v39, 0  ;;  %v511_v50 = vrot.slane %v509_v48, 1  ;;  %v514_v55 = vshrl.u32 %v1728_v53, 16  ;;  %v523_v60 = vshll.u32 %v1729_v59, 16 }
  0x1a   : > { %v602_v46 = vsel %vm1863_vm3, %v505_v45, 0  ;;  %v518_v56 = vrot.slane %v516_v54, 1  ;;  %v521_v61 = vshrl.u32 %v1729_v59, 16 }
  0x1b   : > { %v512_v51 = vor.u32 %v511_v50, %v507_v49  ;;  %v525_v62 = vrot.slane %v523_v60, 1 }
  0x1c   : > { %v519_v57 = vor.u32 %v518_v56, %v514_v55 }
  0x1d   : > { %v603_v52 = vsel %vm1863_vm3, %v512_v51, 0  ;;  %v526_v0 = vor.u32 %v525_v62, %v521_v61  ;;  %v1965_v61 = vld [vmem:[%s1857_s30 + $0x60] sm:$0xff] }
  0x1e   : > { %v604_v58 = vsel %vm1863_vm3, %v519_v57, 0 }
  0x1f   : > { %v605_v3 = vsel %vm1863_vm3, %v526_v0, 0 }
  0x20   : > { %1677 = vmatmul.msk.bf16.gmra.mxu2 %vm624_vm0, %v1722_v15  ;;  %1655 = vmatmul.msk.bf16.gmra.mxu1 %vm624_vm0, %v1721_v4  ;;  %v1730_v4 = vld [vmem:[%s1857_s30 + $0x50] sm:$0xff] }
  0x21   : > { %v530_v8 = vshll.u32 %v1730_v4, 16  ;;  %v528_v14 = vshrl.u32 %v1730_v4, 16 }
  0x27   : > { %1635 = vmatmul.msk.bf16.gmra.mxu0 %vm624_vm0, %v597_v17  ;;  %1699 = vmatmul.msk.bf16.gmra.mxu3 %vm624_vm0, %v598_v22 }
  0x30   : > { %1678 = vmatmul.msk.bf16.gmra.mxu2 %vm624_vm0, %v1723_v23  ;;  %1656 = vmatmul.msk.bf16.gmra.mxu1 %vm624_vm0, %v1722_v15  ;;  %v532_v15 = vrot.slane %v530_v8, 1 }
  0x32   : > { %v533_v19 = vor.u32 %v532_v15, %v528_v14 }
  0x34   : > { %v606_v27 = vsel %vm1863_vm3, %v533_v19, 0 }
  0x37   : > { %1636 = vmatmul.msk.bf16.gmra.mxu0 %vm624_vm0, %v598_v22  ;;  %1700 = vmatmul.msk.bf16.gmra.mxu3 %vm624_vm0, %v599_v28 }
  0x40   : > { %1679 = vmatmul.msk.bf16.gmra.mxu2 %vm624_vm0, %v1724_v29  ;;  %1657 = vmatmul.msk.bf16.gmra.mxu1 %vm624_vm0, %v1723_v23 }
  0x47   : > { %1637 = vmatmul.msk.bf16.gmra.mxu0 %vm624_vm0, %v599_v28  ;;  %1701 = vmatmul.msk.bf16.gmra.mxu3 %vm624_vm0, %v600_v34  ;;  %v1944_v28 = vld [vmem:[%s1857_s30 + $0x58] sm:$0xff] }
  0x48   : > { %v537_v39 = vshll.u32 %v1944_v28, 16  ;;  %v535_v44 = vshrl.u32 %v1944_v28, 16 }
  0x4a   : > { %v539_v45 = vrot.slane %v537_v39, 1 }
  0x4c   : > { %v540_v54 = vor.u32 %v539_v45, %v535_v44 }
  0x4e   : > { %v607_v60 = vsel %vm1863_vm3, %v540_v54, 0 }
  0x50   : > { %1680 = vmatmul.msk.bf16.gmra.mxu2 %vm624_vm0, %v1725_v35  ;;  %1658 = vmatmul.msk.bf16.gmra.mxu1 %vm624_vm0, %v1724_v29 }
  0x57   : > { %1638 = vmatmul.msk.bf16.gmra.mxu0 %vm624_vm0, %v600_v34  ;;  %1702 = vmatmul.msk.bf16.gmra.mxu3 %vm624_vm0, %v601_v40 }
  0x60   : > { %1681 = vmatmul.msk.bf16.gmra.mxu2 %vm624_vm0, %v1726_v41  ;;  %1659 = vmatmul.msk.bf16.gmra.mxu1 %vm624_vm0, %v1725_v35 }
  0x67   : > { %1639 = vmatmul.msk.bf16.gmra.mxu0 %vm624_vm0, %v601_v40  ;;  %1703 = vmatmul.msk.bf16.gmra.mxu3 %vm624_vm0, %v602_v46 }
  0x70   : > { %1682 = vmatmul.msk.bf16.gmra.mxu2 %vm624_vm0, %v1727_v47  ;;  %1660 = vmatmul.msk.bf16.gmra.mxu1 %vm624_vm0, %v1726_v41 }
  0x77   : > { %1640 = vmatmul.msk.bf16.gmra.mxu0 %vm624_vm0, %v602_v46  ;;  %1704 = vmatmul.msk.bf16.gmra.mxu3 %vm624_vm0, %v603_v52 }
  0x80   : > { %1683 = vmatmul.msk.bf16.gmra.mxu2 %vm624_vm0, %v1728_v53  ;;  %1661 = vmatmul.msk.bf16.gmra.mxu1 %vm624_vm0, %v1727_v47 }
  0x87   : > { %1641 = vmatmul.msk.bf16.gmra.mxu0 %vm624_vm0, %v603_v52  ;;  %1705 = vmatmul.msk.bf16.gmra.mxu3 %vm624_vm0, %v604_v58 }
  0x8d   : > { %v809_v63 = vpop.f32.mrf.mxu1 }
  0x90   : > { %1684 = vmatmul.msk.bf16.gmra.mxu2 %vm624_vm0, %v1729_v59  ;;  %1662 = vmatmul.msk.bf16.gmra.mxu1 %vm624_vm0, %v1728_v53 }
  0x93   : > { %v909_v1 = vpop.f32.mrf.mxu2 }
  0x94   : > { %v682_v2 = vpop.f32.mrf.mxu0 }
  0x95   : > { %v810_v5 = vadd.f32 %v809_v63, %v682_v2  ;;  %v811_v6 = vpop.f32.mrf.mxu1 }
  0x97   : > { %1642 = vmatmul.msk.bf16.gmra.mxu0 %vm624_vm0, %v604_v58  ;;  %1706 = vmatmul.msk.bf16.gmra.mxu3 %vm624_vm0, %v605_v3  ;;  %v989_v7 = vadd.f32 %v909_v1, %v810_v5 }
  0x9a   : > { %v1042_v9 = vpop.f32.mrf.mxu3 }
  0x9b   : > { %v1122_v10 = vadd.f32 %v1042_v9, %v989_v7  ;;  %v911_v11 = vpop.f32.mrf.mxu2  ;;  %v544_v7 = vshll.u32 %v1965_v61, 16 }
  0x9c   : > { %v684_v13 = vpop.f32.mrf.mxu0 }
  0x9d   : > { %v1154_v16 = vpack.c.bf16 %v1122_v10, %v1122_v10  ;;  %v812_v17 = vadd.f32 %v811_v6, %v684_v13  ;;  %v814_v18 = vpop.f32.mrf.mxu1  ;;  %v1289_v22 = vmul.f32 %v1122_v10, %v1122_v10  ;;  %v1220_v25 = vsel %vm1219_vm5, %v1122_v10, 0.0 }
  0x9e   : > { %v542_v13 = vshrl.u32 %v1965_v61, 16  ;;  %v546_v14 = vrot.slane %v544_v7, 1 }
  0x9f   : > { %1187 = vst.msk [vmem:[%s1934_s7] sm:$0xf] %vm1186_vm4, %v1154_v16  ;;  %v990_v20 = vadd.f32 %v911_v11, %v812_v17  ;;  %v1321_v35 = vsel %vm1219_vm5, %v1289_v22, 0.0 }
  0xa0   : > { %1685 = vmatmul.msk.bf16.gmra.mxu2 %vm624_vm0, %v1730_v4  ;;  %1663 = vmatmul.msk.bf16.gmra.mxu1 %vm624_vm0, %v1729_v59 }
  0xa2   : > { %v1044_v21 = vpop.f32.mrf.mxu3 }
  0xa3   : > { %v1123_v23 = vadd.f32 %v1044_v21, %v990_v20  ;;  %v914_v24 = vpop.f32.mrf.mxu2 }
  0xa4   : > { %v687_v26 = vpop.f32.mrf.mxu0 }
  0xa5   : > { %v1155_v29 = vpack.c.bf16 %v1123_v23, %v1123_v23  ;;  %v1221_v30 = vsel %vm1219_vm5, %v1123_v23, 0.0  ;;  %v1290_v31 = vmul.f32 %v1123_v23, %v1123_v23  ;;  %v815_v32 = vadd.f32 %v814_v18, %v687_v26  ;;  %v816_v33 = vpop.f32.mrf.mxu1 }
  0xa6   : > { %v1222_v34 = vadd.f32 %v1221_v30, %v1220_v25  ;;  %v547_v23 = vor.u32 %v546_v14, %v542_v13 }
  0xa7   : > { %1188 = vst.msk [vmem:[%s1934_s7 + $0x4] sm:$0xf] %vm1186_vm4, %v1155_v29  ;;  %v1322_v36 = vsel %vm1219_vm5, %v1290_v31, 0.0  ;;  %1643 = vmatmul.msk.bf16.gmra.mxu0 %vm624_vm0, %v605_v3  ;;  %1707 = vmatmul.msk.bf16.gmra.mxu3 %vm624_vm0, %v606_v27  ;;  %v991_v37 = vadd.f32 %v914_v24, %v815_v32  ;;  %v1986_v31 = vld [vmem:[%s1857_s30 + $0x68] sm:$0xff] }
  0xa8   : > { %v1323_v38 = vadd.f32 %v1322_v36, %v1321_v35  ;;  %v608_v30 = vsel %vm1863_vm3, %v547_v23, 0  ;;  %v549_v45 = vshrl.u32 %v1986_v31, 16 }
  0xaa   : > { %v1047_v40 = vpop.f32.mrf.mxu3 }
  0xab   : > { %v1124_v41 = vadd.f32 %v1047_v40, %v991_v37  ;;  %v916_v42 = vpop.f32.mrf.mxu2  ;;  %v551_v40 = vshll.u32 %v1986_v31, 16 }
  0xac   : > { %v689_v43 = vpop.f32.mrf.mxu0 }
  0xad   : > { %v1156_v46 = vpack.c.bf16 %v1124_v41, %v1124_v41  ;;  %v1223_v47 = vsel %vm1219_vm5, %v1124_v41, 0.0  ;;  %v1291_v48 = vmul.f32 %v1124_v41, %v1124_v41  ;;  %v817_v49 = vadd.f32 %v816_v33, %v689_v43  ;;  %v819_v50 = vpop.f32.mrf.mxu1 }
  0xae   : > { %v1224_v51 = vadd.f32 %v1223_v47, %v1222_v34 }
  0xaf   : > { %1189 = vst.msk [vmem:[%s1934_s7 + $0x8] sm:$0xf] %vm1186_vm4, %v1156_v46  ;;  %v1324_v52 = vsel %vm1219_vm5, %v1291_v48, 0.0  ;;  %v992_v55 = vadd.f32 %v916_v42, %v817_v49  ;;  %v553_v46 = vrot.slane %v551_v40, 1 }
  0xb0   : > { %v1325_v53 = vadd.f32 %v1324_v52, %v1323_v38  ;;  %1686 = vmatmul.msk.bf16.gmra.mxu2 %vm624_vm0, %v1944_v28  ;;  %1664 = vmatmul.msk.bf16.gmra.mxu1 %vm624_vm0, %v1730_v4 }
  0xb2   : > { %v1049_v56 = vpop.f32.mrf.mxu3 }
  0xb3   : > { %v1125_v57 = vadd.f32 %v1049_v56, %v992_v55  ;;  %v919_v58 = vpop.f32.mrf.mxu2  ;;  %v554_v55 = vor.u32 %v553_v46, %v549_v45 }
  0xb4   : > { %v692_v59 = vpop.f32.mrf.mxu0 }
  0xb5   : > { %v1157_v62 = vpack.c.bf16 %v1125_v57, %v1125_v57  ;;  %v1225_v63 = vsel %vm1219_vm5, %v1125_v57, 0.0  ;;  %v1292_v0 = vmul.f32 %v1125_v57, %v1125_v57  ;;  %v820_v1 = vadd.f32 %v819_v50, %v692_v59  ;;  %v821_v2 = vpop.f32.mrf.mxu1 }
  0xb6   : > { %v1226_v3 = vadd.f32 %v1225_v63, %v1224_v51  ;;  %v2007_v63 = vld [vmem:[%s1857_s30 + $0x70] sm:$0xff] }
  0xb7   : > { %1190 = vst.msk [vmem:[%s1934_s7 + $0xc] sm:$0xf] %vm1186_vm4, %v1157_v62  ;;  %v1326_v4 = vsel %vm1219_vm5, %v1292_v0, 0.0  ;;  %1644 = vmatmul.msk.bf16.gmra.mxu0 %vm624_vm0, %v606_v27  ;;  %1708 = vmatmul.msk.bf16.gmra.mxu3 %vm624_vm0, %v607_v60  ;;  %v993_v5 = vadd.f32 %v919_v58, %v820_v1  ;;  %v609_v62 = vsel %vm1863_vm3, %v554_v55, 0  ;;  %v556_v14 = vshrl.u32 %v2007_v63, 16 }
  0xb8   : > { %v1327_v6 = vadd.f32 %v1326_v4, %v1325_v53 }
  0xba   : > { %v1052_v8 = vpop.f32.mrf.mxu3 }
  0xbb   : > { %v1126_v9 = vadd.f32 %v1052_v8, %v993_v5  ;;  %v921_v10 = vpop.f32.mrf.mxu2  ;;  %v558_v8 = vshll.u32 %v2007_v63, 16 }
  0xbc   : > { %v694_v11 = vpop.f32.mrf.mxu0 }
  0xbd   : > { %v1158_v15 = vpack.c.bf16 %v1126_v9, %v1126_v9  ;;  %v1227_v16 = vsel %vm1219_vm5, %v1126_v9, 0.0  ;;  %v1293_v17 = vmul.f32 %v1126_v9, %v1126_v9  ;;  %v822_v18 = vadd.f32 %v821_v2, %v694_v11  ;;  %v824_v19 = vpop.f32.mrf.mxu1 }
  0xbe   : > { %v1228_v20 = vadd.f32 %v1227_v16, %v1226_v3 }
  0xbf   : > { %1191 = vst.msk [vmem:[%s1934_s7 + $0x10] sm:$0xf] %vm1186_vm4, %v1158_v15  ;;  %v1328_v21 = vsel %vm1219_vm5, %v1293_v17, 0.0  ;;  %v994_v24 = vadd.f32 %v921_v10, %v822_v18  ;;  %v560_v15 = vrot.slane %v558_v8, 1 }
  0xc0   : > { %v1329_v22 = vadd.f32 %v1328_v21, %v1327_v6  ;;  %1687 = vmatmul.msk.bf16.gmra.mxu2 %vm624_vm0, %v1965_v61  ;;  %1665 = vmatmul.msk.bf16.gmra.mxu1 %vm624_vm0, %v1944_v28 }
  0xc2   : > { %v1054_v25 = vpop.f32.mrf.mxu3 }
  0xc3   : > { %v1127_v26 = vadd.f32 %v1054_v25, %v994_v24  ;;  %v924_v27 = vpop.f32.mrf.mxu2  ;;  %v561_v24 = vor.u32 %v560_v15, %v556_v14 }
  0xc4   : > { %v697_v29 = vpop.f32.mrf.mxu0 }
  0xc5   : > { %v1159_v32 = vpack.c.bf16 %v1127_v26, %v1127_v26  ;;  %v1229_v33 = vsel %vm1219_vm5, %v1127_v26, 0.0  ;;  %v1294_v34 = vmul.f32 %v1127_v26, %v1127_v26  ;;  %v825_v35 = vadd.f32 %v824_v19, %v697_v29  ;;  %v826_v36 = vpop.f32.mrf.mxu1  ;;  %v1741_v26 = vld [vmem:[%s304_s11] sm:$0xff]  }
  0xc6   : > { %v1230_v37 = vadd.f32 %v1229_v33, %v1228_v20  ;;  %v610_v33 = vsel %vm1863_vm3, %v561_v24, 0 }
  0xc7   : > { %1192 = vst.msk [vmem:[%s1934_s7 + $0x14] sm:$0xf] %vm1186_vm4, %v1159_v32  ;;  %v1330_v28 = vsel %vm1219_vm5, %v1294_v34, 0.0  ;;  %1645 = vmatmul.msk.bf16.gmra.mxu0 %vm624_vm0, %v607_v60  ;;  %1709 = vmatmul.msk.bf16.gmra.mxu3 %vm624_vm0, %v608_v30  ;;  %v995_v38 = vadd.f32 %v924_v27, %v825_v35  ;;  %v2032_v34 = vld [vmem:[%s1857_s30 + $0x78] sm:$0xff]  ;;  %v1742_v35 = vunpack.c.l.bf16 %v1741_v26 }
  0xc8   : > { %v1331_v39 = vadd.f32 %v1330_v28, %v1329_v22 }
  0xc9   : > { %v368_v45 = vmul.f32 0.0, %v1742_v35 }
  0xca   : > { %v1057_v41 = vpop.f32.mrf.mxu3 }
  0xcb   : > { %v1128_v42 = vadd.f32 %v1057_v41, %v995_v38  ;;  %v926_v43 = vpop.f32.mrf.mxu2 }
  0xcc   : > { %v699_v44 = vpop.f32.mrf.mxu0 }
  0xcd   : > { %v1160_v47 = vpack.c.bf16 %v1128_v42, %v1128_v42  ;;  %v1231_v48 = vsel %vm1219_vm5, %v1128_v42, 0.0  ;;  %v1295_v49 = vmul.f32 %v1128_v42, %v1128_v42  ;;  %v827_v50 = vadd.f32 %v826_v36, %v699_v44  ;;  %v829_v51 = vpop.f32.mrf.mxu1 }
  0xce   : > { %v1232_v52 = vadd.f32 %v1231_v48, %v1230_v37  ;;  %v1743_v36 = vunpack.c.h.bf16 %v1741_v26  ;;  %v565_v44 = vshll.u32 %v2032_v34, 16 }
  0xcf   : > { %1193 = vst.msk [vmem:[%s1934_s7 + $0x18] sm:$0xf] %vm1186_vm4, %v1160_v47  ;;  %v1332_v53 = vsel %vm1219_vm5, %v1295_v49, 0.0  ;;  %v996_v56 = vadd.f32 %v926_v43, %v827_v50 }
  0xd0   : > { %v1333_v54 = vadd.f32 %v1332_v53, %v1331_v39  ;;  %1688 = vmatmul.msk.bf16.gmra.mxu2 %vm624_vm0, %v1986_v31  ;;  %1666 = vmatmul.msk.bf16.gmra.mxu1 %vm624_vm0, %v1965_v61  ;;  %v369_v46 = vmul.f32 0.0, %v1743_v36  ;;  %v370_v53 = vpack.c.bf16 %v368_v45, %v368_v45 }
  0xd2   : > { %v1059_v57 = vpop.f32.mrf.mxu3 }
  0xd3   : > { %v1129_v58 = vadd.f32 %v1059_v57, %v996_v56  ;;  %v929_v59 = vpop.f32.mrf.mxu2 }
  0xd4   : > { %v702_v60 = vpop.f32.mrf.mxu0 }
  0xd5   : > { %v1161_v0 = vpack.c.bf16 %v1129_v58, %v1129_v58  ;;  %v1233_v1 = vsel %vm1219_vm5, %v1129_v58, 0.0  ;;  %v1296_v2 = vmul.f32 %v1129_v58, %v1129_v58  ;;  %v830_v3 = vadd.f32 %v829_v51, %v702_v60  ;;  %v831_v4 = vpop.f32.mrf.mxu1 }
  0xd6   : > { %v1234_v5 = vadd.f32 %v1233_v1, %v1232_v52  ;;  %v563_v51 = vshrl.u32 %v2032_v34, 16  ;;  %v567_v52 = vrot.slane %v565_v44, 1 }
  0xd7   : > { %1194 = vst.msk [vmem:[%s1934_s7 + $0x1c] sm:$0xf] %vm1186_vm4, %v1161_v0  ;;  %v1334_v61 = vsel %vm1219_vm5, %v1296_v2, 0.0  ;;  %1646 = vmatmul.msk.bf16.gmra.mxu0 %vm624_vm0, %v608_v30  ;;  %1710 = vmatmul.msk.bf16.gmra.mxu3 %vm624_vm0, %v609_v62  ;;  %v997_v6 = vadd.f32 %v929_v59, %v830_v3  ;;  %v438_v2 = vunpack.c.l.b16 %v370_v53 }
  0xd8   : > { %v1335_v7 = vadd.f32 %v1334_v61, %v1333_v54  ;;  %v371_v54 = vpack.c.bf16 %v369_v46, %v369_v46  ;;  %v568_v1 = vor.u32 %v567_v52, %v563_v51 }
  0xda   : > { %v1062_v9 = vpop.f32.mrf.mxu3  ;;  %v439_v3 = vunpack.c.l.b16 %v371_v54  ;;  %v611_v8 = vsel %vm1863_vm3, %v568_v1, 0 }
  0xdb   : > { %v1130_v10 = vadd.f32 %v1062_v9, %v997_v6  ;;  %v931_v11 = vpop.f32.mrf.mxu2 }
  0xdc   : > { %v704_v13 = vpop.f32.mrf.mxu0  ;;  %v456_v9 = vpack.c.b16 %v439_v3, %v438_v2 }
  0xdd   : > { %v1162_v16 = vpack.c.bf16 %v1130_v10, %v1130_v10  ;;  %v1235_v17 = vsel %vm1219_vm5, %v1130_v10, 0.0  ;;  %v1297_v18 = vmul.f32 %v1130_v10, %v1130_v10  ;;  %v832_v19 = vadd.f32 %v831_v4, %v704_v13  ;;  %v834_v20 = vpop.f32.mrf.mxu1 }
  0xde   : > { %v1236_v21 = vadd.f32 %v1235_v17, %v1234_v5  ;;  %v570_v24 = vshrl.u32 %v456_v9, 16 }
  0xdf   : > { %1195 = vst.msk [vmem:[%s1934_s7 + $0x20] sm:$0xf] %vm1186_vm4, %v1162_v16  ;;  %v1336_v22 = vsel %vm1219_vm5, %v1297_v18, 0.0  ;;  %v998_v25 = vadd.f32 %v931_v11, %v832_v19  ;;  %v572_v19 = vshll.u32 %v456_v9, 16 }
  0xe0   : > { %v1337_v23 = vadd.f32 %v1336_v22, %v1335_v7  ;;  %1689 = vmatmul.msk.bf16.gmra.mxu2 %vm624_vm0, %v2007_v63  ;;  %1667 = vmatmul.msk.bf16.gmra.mxu1 %vm624_vm0, %v1986_v31 }
  0xe2   : > { %v1064_v27 = vpop.f32.mrf.mxu3 }
  0xe3   : > { %v1131_v29 = vadd.f32 %v1064_v27, %v998_v25  ;;  %v934_v30 = vpop.f32.mrf.mxu2  ;;  %v574_v25 = vrot.slane %v572_v19, 1 }
  0xe4   : > { %v707_v32 = vpop.f32.mrf.mxu0 }
  0xe5   : > { %v1163_v37 = vpack.c.bf16 %v1131_v29, %v1131_v29  ;;  %v1237_v28 = vsel %vm1219_vm5, %v1131_v29, 0.0  ;;  %v1298_v38 = vmul.f32 %v1131_v29, %v1131_v29  ;;  %v835_v31 = vadd.f32 %v834_v20, %v707_v32  ;;  %v836_v39 = vpop.f32.mrf.mxu1 }
  0xe6   : > { %v1238_v40 = vadd.f32 %v1237_v28, %v1236_v21 }
  0xe7   : > { %1196 = vst.msk [vmem:[%s1934_s7 + $0x24] sm:$0xf] %vm1186_vm4, %v1163_v37  ;;  %v1338_v41 = vsel %vm1219_vm5, %v1298_v38, 0.0  ;;  %1647 = vmatmul.msk.bf16.gmra.mxu0 %vm624_vm0, %v609_v62  ;;  %1711 = vmatmul.msk.bf16.gmra.mxu3 %vm624_vm0, %v610_v33  ;;  %v999_v42 = vadd.f32 %v934_v30, %v835_v31  ;;  %v575_v37 = vor.u32 %v574_v25, %v570_v24 }
  0xe8   : > { %v1339_v43 = vadd.f32 %v1338_v41, %v1337_v23 }
  0xe9   : > { %v612_v41 = vsel %vm1863_vm3, %v575_v37, 0 }
  0xea   : > { %v1067_v47 = vpop.f32.mrf.mxu3 }
  0xeb   : > { %v1132_v48 = vadd.f32 %v1067_v47, %v999_v42  ;;  %v936_v49 = vpop.f32.mrf.mxu2 }
  0xec   : > { %v709_v50 = vpop.f32.mrf.mxu0 }
  0xed   : > { %v1164_v55 = vpack.c.bf16 %v1132_v48, %v1132_v48  ;;  %v1239_v56 = vsel %vm1219_vm5, %v1132_v48, 0.0  ;;  %v1299_v57 = vmul.f32 %v1132_v48, %v1132_v48  ;;  %v837_v58 = vadd.f32 %v836_v39, %v709_v50  ;;  %v839_v59 = vpop.f32.mrf.mxu1 }
  0xee   : > { %v1240_v60 = vadd.f32 %v1239_v56, %v1238_v40 }
  0xef   : > { %1197 = vst.msk [vmem:[%s1934_s7 + $0x28] sm:$0xf] %vm1186_vm4, %v1164_v55  ;;  %v1340_v62 = vsel %vm1219_vm5, %v1299_v57, 0.0  ;;  %v1000_v4 = vadd.f32 %v936_v49, %v837_v58 }
  0xf0   : > { %v1341_v0 = vadd.f32 %v1340_v62, %v1339_v43  ;;  %1690 = vmatmul.msk.bf16.gmra.mxu2 %vm624_vm0, %v2032_v34  ;;  %1668 = vmatmul.msk.bf16.gmra.mxu1 %vm624_vm0, %v2007_v63 }
  0xf2   : > { %v1069_v5 = vpop.f32.mrf.mxu3 }
  0xf3   : > { %v1133_v61 = vadd.f32 %v1069_v5, %v1000_v4  ;;  %v939_v6 = vpop.f32.mrf.mxu2 }
  0xf4   : > { %v712_v7 = vpop.f32.mrf.mxu0 }
  0xf5   : > { %v1165_v10 = vpack.c.bf16 %v1133_v61, %v1133_v61  ;;  %v1241_v11 = vsel %vm1219_vm5, %v1133_v61, 0.0  ;;  %v1300_v13 = vmul.f32 %v1133_v61, %v1133_v61  ;;  %v840_v14 = vadd.f32 %v839_v59, %v712_v7  ;;  %v841_v15 = vpop.f32.mrf.mxu1 }
  0xf6   : > { %v1242_v63 = vadd.f32 %v1241_v11, %v1240_v60 }
  0xf7   : > { %1198 = vst.msk [vmem:[%s1934_s7 + $0x2c] sm:$0xf] %vm1186_vm4, %v1165_v10  ;;  %v1342_v16 = vsel %vm1219_vm5, %v1300_v13, 0.0  ;;  %1648 = vmatmul.msk.bf16.gmra.mxu0 %vm624_vm0, %v610_v33  ;;  %1712 = vmatmul.msk.bf16.gmra.mxu3 %vm624_vm0, %v611_v8  ;;  %v1001_v17 = vadd.f32 %v939_v6, %v840_v14 }
  0xf8   : > { %v1343_v18 = vadd.f32 %v1342_v16, %v1341_v0 }
  0xfa   : > { %v1072_v20 = vpop.f32.mrf.mxu3 }
  0xfb   : > { %v1134_v21 = vadd.f32 %v1072_v20, %v1001_v17  ;;  %v941_v22 = vpop.f32.mrf.mxu2 }
  0xfc   : > { %v714_v23 = vpop.f32.mrf.mxu0 }
  0xfd   : > { %v1166_v26 = vpack.c.bf16 %v1134_v21, %v1134_v21  ;;  %v1243_v27 = vsel %vm1219_vm5, %v1134_v21, 0.0  ;;  %v1301_v29 = vmul.f32 %v1134_v21, %v1134_v21  ;;  %v842_v30 = vadd.f32 %v841_v15, %v714_v23  ;;  %v844_v32 = vpop.f32.mrf.mxu1 }
  0xfe   : > { %v1244_v35 = vadd.f32 %v1243_v27, %v1242_v63 }
  0xff   : > { %1199 = vst.msk [vmem:[%s1934_s7 + $0x30] sm:$0xf] %vm1186_vm4, %v1166_v26  ;;  %v1344_v33 = vsel %vm1219_vm5, %v1301_v29, 0.0  ;;  %v1002_v28 = vadd.f32 %v941_v22, %v842_v30 }
 0x100   : > { %v1345_v36 = vadd.f32 %v1344_v33, %v1343_v18  ;;  %1691 = vmatmul.msk.bf16.gmra.mxu2 %vm624_vm0, %v456_v9  ;;  %1669 = vmatmul.msk.bf16.gmra.mxu1 %vm624_vm0, %v2032_v34 }
 0x102   : > { %v1074_v38 = vpop.f32.mrf.mxu3 }
 0x103   : > { %v1135_v31 = vadd.f32 %v1074_v38, %v1002_v28  ;;  %v944_v39 = vpop.f32.mrf.mxu2 }
 0x104   : > { %v717_v40 = vpop.f32.mrf.mxu0 }
 0x105   : > { %v1167_v42 = vpack.c.bf16 %v1135_v31, %v1135_v31  ;;  %v1245_v43 = vsel %vm1219_vm5, %v1135_v31, 0.0  ;;  %v1302_v44 = vmul.f32 %v1135_v31, %v1135_v31  ;;  %v845_v45 = vadd.f32 %v844_v32, %v717_v40  ;;  %v846_v46 = vpop.f32.mrf.mxu1 }
 0x106   : > { %v1246_v47 = vadd.f32 %v1245_v43, %v1244_v35 }
 0x107   : > { %1200 = vst.msk [vmem:[%s1934_s7 + $0x34] sm:$0xf] %vm1186_vm4, %v1167_v42  ;;  %v1346_v34 = vsel %vm1219_vm5, %v1302_v44, 0.0  ;;  %1649 = vmatmul.msk.bf16.gmra.mxu0 %vm624_vm0, %v611_v8  ;;  %1713 = vmatmul.msk.bf16.gmra.mxu3 %vm624_vm0, %v612_v41  ;;  %v1003_v48 = vadd.f32 %v944_v39, %v845_v45 }
 0x108   : > { %v1347_v49 = vadd.f32 %v1346_v34, %v1345_v36 }
 0x10a   : > { %v1077_v12 = vpop.f32.mrf.mxu3 }
 0x10b   : > { %v1136_v50 = vadd.f32 %v1077_v12, %v1003_v48  ;;  %v946_v51 = vpop.f32.mrf.mxu2 }
 0x10c   : > { %v719_v52 = vpop.f32.mrf.mxu0 }
 0x10d   : > { %v1168_v53 = vpack.c.bf16 %v1136_v50, %v1136_v50  ;;  %v1247_v54 = vsel %vm1219_vm5, %v1136_v50, 0.0  ;;  %v1303_v55 = vmul.f32 %v1136_v50, %v1136_v50  ;;  %v847_v56 = vadd.f32 %v846_v46, %v719_v52  ;;  %v849_v57 = vpop.f32.mrf.mxu1 }
 0x10e   : > { %v1248_v58 = vadd.f32 %v1247_v54, %v1246_v47 }
 0x10f   : > { %1201 = vst.msk [vmem:[%s1934_s7 + $0x38] sm:$0xf] %vm1186_vm4, %v1168_v53  ;;  %v1348_v59 = vsel %vm1219_vm5, %v1303_v55, 0.0  ;;  %v1004_v62 = vadd.f32 %v946_v51, %v847_v56 }
 0x110   : > { %v1349_v60 = vadd.f32 %v1348_v59, %v1347_v49 }
 0x112   : > { %v1079_v0 = vpop.f32.mrf.mxu3 }
 0x113   : > { %v1137_v1 = vadd.f32 %v1079_v0, %v1004_v62  ;;  %v949_v2 = vpop.f32.mrf.mxu2 }
 0x114   : > { %v722_v3 = vpop.f32.mrf.mxu0 }
 0x115   : > { %v1169_v4 = vpack.c.bf16 %v1137_v1, %v1137_v1  ;;  %v1249_v5 = vsel %vm1219_vm5, %v1137_v1, 0.0  ;;  %v1304_v61 = vmul.f32 %v1137_v1, %v1137_v1  ;;  %v850_v6 = vadd.f32 %v849_v57, %v722_v3  ;;  %v851_v7 = vpop.f32.mrf.mxu1 }
 0x116   : > { %v1250_v8 = vadd.f32 %v1249_v5, %v1248_v58 }
 0x117   : > { %1202 = vst.msk [vmem:[%s1934_s7 + $0x3c] sm:$0xf] %vm1186_vm4, %v1169_v4  ;;  %v1350_v9 = vsel %vm1219_vm5, %v1304_v61, 0.0  ;;  %v1005_v10 = vadd.f32 %v949_v2, %v850_v6 }
 0x118   : > { %v1351_v11 = vadd.f32 %v1350_v9, %v1349_v60 }
 0x11a   : > { %v1082_v13 = vpop.f32.mrf.mxu3 }
 0x11b   : > { %v1138_v14 = vadd.f32 %v1082_v13, %v1005_v10  ;;  %v951_v15 = vpop.f32.mrf.mxu2 }
 0x11c   : > { %v724_v63 = vpop.f32.mrf.mxu0 }
 0x11d   : > { %v1170_v16 = vpack.c.bf16 %v1138_v14, %v1138_v14  ;;  %v1251_v17 = vsel %vm1219_vm5, %v1138_v14, 0.0  ;;  %v1305_v18 = vmul.f32 %v1138_v14, %v1138_v14  ;;  %v852_v19 = vadd.f32 %v851_v7, %v724_v63  ;;  %v854_v20 = vpop.f32.mrf.mxu1 }
 0x11e   : > { %v1252_v21 = vadd.f32 %v1251_v17, %v1250_v8 }
 0x11f   : > { %1203 = vst.msk [vmem:[%s1934_s7 + $0x40] sm:$0xf] %vm1186_vm4, %v1170_v16  ;;  %v1352_v22 = vsel %vm1219_vm5, %v1305_v18, 0.0  ;;  %v1006_v24 = vadd.f32 %v951_v15, %v852_v19 }
 0x120   : > { %v1353_v23 = vadd.f32 %v1352_v22, %v1351_v11 }
 0x122   : > { %v1084_v25 = vpop.f32.mrf.mxu3 }
 0x123   : > { %v1139_v26 = vadd.f32 %v1084_v25, %v1006_v24  ;;  %v954_v27 = vpop.f32.mrf.mxu2 }
 0x124   : > { %v727_v29 = vpop.f32.mrf.mxu0 }
 0x125   : > { %v1171_v30 = vpack.c.bf16 %v1139_v26, %v1139_v26  ;;  %v1253_v32 = vsel %vm1219_vm5, %v1139_v26, 0.0  ;;  %v1306_v35 = vmul.f32 %v1139_v26, %v1139_v26  ;;  %v855_v33 = vadd.f32 %v854_v20, %v727_v29  ;;  %v856_v36 = vpop.f32.mrf.mxu1 }
 0x126   : > { %v1254_v37 = vadd.f32 %v1253_v32, %v1252_v21 }
 0x127   : > { %1204 = vst.msk [vmem:[%s1934_s7 + $0x44] sm:$0xf] %vm1186_vm4, %v1171_v30  ;;  %v1354_v28 = vsel %vm1219_vm5, %v1306_v35, 0.0  ;;  %v1007_v38 = vadd.f32 %v954_v27, %v855_v33 }
 0x128   : > { %v1355_v31 = vadd.f32 %v1354_v28, %v1353_v23 }
 0x12a   : > { %v1087_v39 = vpop.f32.mrf.mxu3 }
 0x12b   : > { %v1140_v40 = vadd.f32 %v1087_v39, %v1007_v38  ;;  %v956_v41 = vpop.f32.mrf.mxu2 }
 0x12c   : > { %v729_v42 = vpop.f32.mrf.mxu0 }
 0x12d   : > { %v1172_v43 = vpack.c.bf16 %v1140_v40, %v1140_v40  ;;  %v1255_v44 = vsel %vm1219_vm5, %v1140_v40, 0.0  ;;  %v1307_v45 = vmul.f32 %v1140_v40, %v1140_v40  ;;  %v857_v46 = vadd.f32 %v856_v36, %v729_v42  ;;  %v859_v47 = vpop.f32.mrf.mxu1 }
 0x12e   : > { %v1256_v34 = vadd.f32 %v1255_v44, %v1254_v37 }
 0x12f   : > { %1205 = vst.msk [vmem:[%s1934_s7 + $0x48] sm:$0xf] %vm1186_vm4, %v1172_v43  ;;  %v1356_v48 = vsel %vm1219_vm5, %v1307_v45, 0.0  ;;  %v1008_v12 = vadd.f32 %v956_v41, %v857_v46 }
 0x130   : > { %v1357_v49 = vadd.f32 %v1356_v48, %v1355_v31 }
 0x132   : > { %v1089_v50 = vpop.f32.mrf.mxu3 }
 0x133   : > { %v1141_v51 = vadd.f32 %v1089_v50, %v1008_v12  ;;  %v959_v52 = vpop.f32.mrf.mxu2 }
 0x134   : > { %v732_v53 = vpop.f32.mrf.mxu0 }
 0x135   : > { %v1173_v54 = vpack.c.bf16 %v1141_v51, %v1141_v51  ;;  %v1257_v55 = vsel %vm1219_vm5, %v1141_v51, 0.0  ;;  %v1308_v56 = vmul.f32 %v1141_v51, %v1141_v51  ;;  %v860_v57 = vadd.f32 %v859_v47, %v732_v53  ;;  %v861_v58 = vpop.f32.mrf.mxu1 }
 0x136   : > { %v1258_v59 = vadd.f32 %v1257_v55, %v1256_v34 }
 0x137   : > { %1206 = vst.msk [vmem:[%s1934_s7 + $0x4c] sm:$0xf] %vm1186_vm4, %v1173_v54  ;;  %v1358_v60 = vsel %vm1219_vm5, %v1308_v56, 0.0  ;;  %v1009_v62 = vadd.f32 %v959_v52, %v860_v57 }
 0x138   : > { %v1359_v0 = vadd.f32 %v1358_v60, %v1357_v49 }
 0x13a   : > { %v1092_v1 = vpop.f32.mrf.mxu3 }
 0x13b   : > { %v1142_v2 = vadd.f32 %v1092_v1, %v1009_v62  ;;  %v961_v3 = vpop.f32.mrf.mxu2 }
 0x13c   : > { %v734_v4 = vpop.f32.mrf.mxu0 }
 0x13d   : > { %v1174_v5 = vpack.c.bf16 %v1142_v2, %v1142_v2  ;;  %v1259_v61 = vsel %vm1219_vm5, %v1142_v2, 0.0  ;;  %v1309_v6 = vmul.f32 %v1142_v2, %v1142_v2  ;;  %v862_v7 = vadd.f32 %v861_v58, %v734_v4  ;;  %v864_v8 = vpop.f32.mrf.mxu1 }
 0x13e   : > { %v2098_v9 = vadd.f32 %v1259_v61, %v1258_v59 }
 0x13f   : > { %1207 = vst.msk [vmem:[%s1934_s7 + $0x50] sm:$0xf] %vm1186_vm4, %v1174_v5  ;;  %v1360_v10 = vsel %vm1219_vm5, %v1309_v6, 0.0  ;;  %v1010_v13 = vadd.f32 %v961_v3, %v862_v7 }
 0x140   : > { %v2103_v11 = vadd.f32 %v1360_v10, %v1359_v0 }
 0x142   : > { %v1094_v14 = vpop.f32.mrf.mxu3 }
 0x143   : > { %v2105_v15 = vadd.f32 %v1094_v14, %v1010_v13  ;;  %v964_v63 = vpop.f32.mrf.mxu2 }
 0x144   : > { %v737_v16 = vpop.f32.mrf.mxu0 }
 0x145   : > { %v1175_v17 = vpack.c.bf16 %v2105_v15, %v2105_v15  ;;  %v865_v18 = vadd.f32 %v864_v8, %v737_v16  ;;  %v866_v19 = vpop.f32.mrf.mxu1  ;;  %v1310_v10 = vmul.f32 %v2105_v15, %v2105_v15 }
 0x147   : > { %1208 = vst.msk [vmem:[%s1934_s7 + $0x54] sm:$0xf] %vm1186_vm4, %v1175_v17  ;;  %v1011_v20 = vadd.f32 %v964_v63, %v865_v18  ;;  %v1261_v63 = vsel %vm1219_vm5, %v2105_v15, 0.0  ;;  %v1362_v18 = vsel %vm1219_vm5, %v1310_v10, 0.0 }
 0x14a   : > { %v1097_v21 = vpop.f32.mrf.mxu3 }
 0x14b   : > { %v2111_v22 = vadd.f32 %v1097_v21, %v1011_v20  ;;  %v966_v23 = vpop.f32.mrf.mxu2  ;;  %v1262_v21 = vadd.f32 %v1261_v63, %v2098_v9 }
 0x14c   : > { %v739_v24 = vpop.f32.mrf.mxu0 }
 0x14d   : > { %v1176_v25 = vpack.c.bf16 %v2111_v22, %v2111_v22  ;;  %v867_v26 = vadd.f32 %v866_v19, %v739_v24  ;;  %v869_v27 = vpop.f32.mrf.mxu1  ;;  %v1311_v16 = vmul.f32 %v2111_v22, %v2111_v22  ;;  %v1263_v19 = vsel %vm1219_vm5, %v2111_v22, 0.0 }
 0x14f   : > { %1209 = vst.msk [vmem:[%s1934_s7 + $0x58] sm:$0xf] %vm1186_vm4, %v1176_v25  ;;  %v1012_v29 = vadd.f32 %v966_v23, %v867_v26  ;;  %v1364_v25 = vsel %vm1219_vm5, %v1311_v16, 0.0 }
 0x152   : > { %v1099_v30 = vpop.f32.mrf.mxu3 }
 0x153   : > { %v1145_v32 = vadd.f32 %v1099_v30, %v1012_v29  ;;  %v969_v35 = vpop.f32.mrf.mxu2  ;;  %v1363_v29 = vadd.f32 %v1362_v18, %v2103_v11  ;;  %v1264_v30 = vadd.f32 %v1263_v19, %v1262_v21 }
 0x154   : > { %v742_v33 = vpop.f32.mrf.mxu0 }
 0x155   : > { %v1177_v36 = vpack.c.bf16 %v1145_v32, %v1145_v32  ;;  %v870_v37 = vadd.f32 %v869_v27, %v742_v33  ;;  %v871_v28 = vpop.f32.mrf.mxu1  ;;  %v1312_v17 = vmul.f32 %v1145_v32, %v1145_v32  ;;  %v1265_v15 = vsel %vm1219_vm5, %v1145_v32, 0.0 }
 0x157   : > { %1210 = vst.msk [vmem:[%s1934_s7 + $0x5c] sm:$0xf] %vm1186_vm4, %v1177_v36  ;;  %v1013_v38 = vadd.f32 %v969_v35, %v870_v37  ;;  %v1366_v35 = vsel %vm1219_vm5, %v1312_v17, 0.0 }
 0x15a   : > { %v1102_v31 = vpop.f32.mrf.mxu3 }
 0x15b   : > { %v1146_v39 = vadd.f32 %v1102_v31, %v1013_v38  ;;  %v971_v40 = vpop.f32.mrf.mxu2  ;;  %v1266_v38 = vadd.f32 %v1265_v15, %v1264_v30 }
 0x15c   : > { %v744_v41 = vpop.f32.mrf.mxu0 }
 0x15d   : > { %v1178_v42 = vpack.c.bf16 %v1146_v39, %v1146_v39  ;;  %v872_v43 = vadd.f32 %v871_v28, %v744_v41  ;;  %v874_v44 = vpop.f32.mrf.mxu1  ;;  %v1313_v26 = vmul.f32 %v1146_v39, %v1146_v39  ;;  %v1267_v22 = vsel %vm1219_vm5, %v1146_v39, 0.0 }
 0x15e   : > { %v1365_v28 = vadd.f32 %v1364_v25, %v1363_v29 }
 0x15f   : > { %1211 = vst.msk [vmem:[%s1934_s7 + $0x60] sm:$0xf] %vm1186_vm4, %v1178_v42  ;;  %v1014_v45 = vadd.f32 %v971_v40, %v872_v43  ;;  %v1368_v40 = vsel %vm1219_vm5, %v1313_v26, 0.0  ;;  %v1268_v43 = vadd.f32 %v1267_v22, %v1266_v38 }
 0x160   : > { %v1367_v42 = vadd.f32 %v1366_v35, %v1365_v28 }
 0x162   : > { %v1104_v46 = vpop.f32.mrf.mxu3 }
 0x163   : > { %v1147_v47 = vadd.f32 %v1104_v46, %v1014_v45  ;;  %v974_v34 = vpop.f32.mrf.mxu2  ;;  %v1369_v46 = vadd.f32 %v1368_v40, %v1367_v42 }
 0x164   : > { %v747_v48 = vpop.f32.mrf.mxu0 }
 0x165   : > { %v1179_v49 = vpack.c.bf16 %v1147_v47, %v1147_v47  ;;  %v875_v12 = vadd.f32 %v874_v44, %v747_v48  ;;  %v876_v50 = vpop.f32.mrf.mxu1  ;;  %v1314_v36 = vmul.f32 %v1147_v47, %v1147_v47  ;;  %v1269_v32 = vsel %vm1219_vm5, %v1147_v47, 0.0 }
 0x167   : > { %1212 = vst.msk [vmem:[%s1934_s7 + $0x64] sm:$0xf] %vm1186_vm4, %v1179_v49  ;;  %v1015_v51 = vadd.f32 %v974_v34, %v875_v12  ;;  %v1370_v45 = vsel %vm1219_vm5, %v1314_v36, 0.0  ;;  %v1270_v34 = vadd.f32 %v1269_v32, %v1268_v43 }
 0x16a   : > { %v1107_v52 = vpop.f32.mrf.mxu3 }
 0x16b   : > { %v1148_v53 = vadd.f32 %v1107_v52, %v1015_v51  ;;  %v976_v54 = vpop.f32.mrf.mxu2  ;;  %v1371_v51 = vadd.f32 %v1370_v45, %v1369_v46 }
 0x16c   : > { %v749_v55 = vpop.f32.mrf.mxu0 }
 0x16d   : > { %v1180_v56 = vpack.c.bf16 %v1148_v53, %v1148_v53  ;;  %v877_v57 = vadd.f32 %v876_v50, %v749_v55  ;;  %v879_v58 = vpop.f32.mrf.mxu1  ;;  %v1315_v41 = vmul.f32 %v1148_v53, %v1148_v53  ;;  %v1271_v39 = vsel %vm1219_vm5, %v1148_v53, 0.0 }
 0x16e   : > { %v1272_v52 = vadd.f32 %v1271_v39, %v1270_v34 }
 0x16f   : > { %1213 = vst.msk [vmem:[%s1934_s7 + $0x68] sm:$0xf] %vm1186_vm4, %v1180_v56  ;;  %v1016_v59 = vadd.f32 %v976_v54, %v877_v57  ;;  %v1372_v49 = vsel %vm1219_vm5, %v1315_v41, 0.0 }
 0x172   : > { %v1109_v60 = vpop.f32.mrf.mxu3 }
 0x173   : > { %v1149_v62 = vadd.f32 %v1109_v60, %v1016_v59  ;;  %v979_v0 = vpop.f32.mrf.mxu2  ;;  %v1373_v60 = vadd.f32 %v1372_v49, %v1371_v51 }
 0x174   : > { %v752_v1 = vpop.f32.mrf.mxu0 }
 0x175   : > { %v1181_v2 = vpack.c.bf16 %v1149_v62, %v1149_v62  ;;  %v880_v3 = vadd.f32 %v879_v58, %v752_v1  ;;  %v881_v5 = vpop.f32.mrf.mxu1  ;;  %v1316_v44 = vmul.f32 %v1149_v62, %v1149_v62  ;;  %v1273_v12 = vsel %vm1219_vm5, %v1149_v62, 0.0 }
 0x177   : > { %1214 = vst.msk [vmem:[%s1934_s7 + $0x6c] sm:$0xf] %vm1186_vm4, %v1181_v2  ;;  %v1017_v4 = vadd.f32 %v979_v0, %v880_v3  ;;  %v1374_v54 = vsel %vm1219_vm5, %v1316_v44, 0.0  ;;  %v1274_v0 = vadd.f32 %v1273_v12, %v1272_v52 }
 0x178   : > { %v1375_v3 = vadd.f32 %v1374_v54, %v1373_v60 }
 0x17a   : > { %v1112_v61 = vpop.f32.mrf.mxu3 }
 0x17b   : > { %v1150_v6 = vadd.f32 %v1112_v61, %v1017_v4  ;;  %v981_v7 = vpop.f32.mrf.mxu2 }
 0x17c   : > { %v754_v8 = vpop.f32.mrf.mxu0 }
 0x17d   : > { %v1182_v13 = vpack.c.bf16 %v1150_v6, %v1150_v6  ;;  %v882_v14 = vadd.f32 %v881_v5, %v754_v8  ;;  %v884_v23 = vpop.f32.mrf.mxu1  ;;  %v1317_v47 = vmul.f32 %v1150_v6, %v1150_v6  ;;  %v1275_v57 = vsel %vm1219_vm5, %v1150_v6, 0.0 }
 0x17e   : > { %v1276_v4 = vadd.f32 %v1275_v57, %v1274_v0 }
 0x17f   : > { %1215 = vst.msk [vmem:[%s1934_s7 + $0x70] sm:$0xf] %vm1186_vm4, %v1182_v13  ;;  %v1018_v20 = vadd.f32 %v981_v7, %v882_v14  ;;  %v1376_v1 = vsel %vm1219_vm5, %v1317_v47, 0.0 }
 0x180   : > { %v1377_v8 = vadd.f32 %v1376_v1, %v1375_v3 }
 0x182   : > { %v1114_v24 = vpop.f32.mrf.mxu3 }
 0x183   : > { %v1151_v27 = vadd.f32 %v1114_v24, %v1018_v20  ;;  %v984_v31 = vpop.f32.mrf.mxu2 }
 0x184   : > { %v757_v33 = vpop.f32.mrf.mxu0 }
 0x185   : > { %v1183_v37 = vpack.c.bf16 %v1151_v27, %v1151_v27  ;;  %v885_v9 = vadd.f32 %v884_v23, %v757_v33  ;;  %v886_v55 = vpop.f32.mrf.mxu1  ;;  %v1318_v58 = vmul.f32 %v1151_v27, %v1151_v27  ;;  %v1277_v62 = vsel %vm1219_vm5, %v1151_v27, 0.0 }
 0x186   : > { %v1278_v10 = vadd.f32 %v1277_v62, %v1276_v4 }
 0x187   : > { %1216 = vst.msk [vmem:[%s1934_s7 + $0x74] sm:$0xf] %vm1186_vm4, %v1183_v37  ;;  %v1019_v11 = vadd.f32 %v984_v31, %v885_v9  ;;  %v1378_v61 = vsel %vm1219_vm5, %v1318_v58, 0.0 }
 0x188   : > { %v1379_v16 = vadd.f32 %v1378_v61, %v1377_v8 }
 0x18a   : > { %v1117_v48 = vpop.f32.mrf.mxu3 }
 0x18b   : > { %v1152_v50 = vadd.f32 %v1117_v48, %v1019_v11  ;;  %v986_v5 = vpop.f32.mrf.mxu2 }
 0x18c   : > { %v759_v56 = vpop.f32.mrf.mxu0 }
 0x18d   : > { %v1184_v53 = vpack.c.bf16 %v1152_v50, %v1152_v50  ;;  %v887_v59 = vadd.f32 %v886_v55, %v759_v56  ;;  %v1319_v2 = vmul.f32 %v1152_v50, %v1152_v50  ;;  %v1279_v6 = vsel %vm1219_vm5, %v1152_v50, 0.0 }
 0x18e   : > { %v1280_v17 = vadd.f32 %v1279_v6, %v1278_v10 }
 0x18f   : > { %1217 = vst.msk [vmem:[%s1934_s7 + $0x78] sm:$0xf] %vm1186_vm4, %v1184_v53  ;;  %v1020_v7 = vadd.f32 %v986_v5, %v887_v59  ;;  %v1380_v14 = vsel %vm1219_vm5, %v1319_v2, 0.0 }
 0x190   : > { %v1381_v21 = vadd.f32 %v1380_v14, %v1379_v16 }
 0x192   : > { %v1119_v13 = vpop.f32.mrf.mxu3 }
 0x193   : > { %v1153_v63 = vadd.f32 %v1119_v13, %v1020_v7 }
 0x195   : > { %v1185_v18 = vpack.c.bf16 %v1153_v63, %v1153_v63  ;;  %v1281_v19 = vsel %vm1219_vm5, %v1153_v63, 0.0  ;;  %v1320_v20 = vmul.f32 %v1153_v63, %v1153_v63 }
 0x196   : > { %v1282_v23 = vadd.f32 %v1281_v19, %v1280_v17 }
 0x197   : > { %1218 = vst.msk [vmem:[%s1934_s7 + $0x7c] sm:$0xf] %vm1186_vm4, %v1185_v18  ;;  %v1382_v24 = vsel %vm1219_vm5, %v1320_v20, 0.0 }
 0x198   : > { %v1283_v25 = vrot.slane %v1282_v23, 4  ;;  %v1383_v15 = vadd.f32 %v1382_v24, %v1381_v21 }
 0x19a   : > { %v1284_v26 = vadd.f32 %v1283_v25, %v1282_v23  ;;  %v1384_v27 = vrot.slane %v1383_v15, 4 }
 0x19c   : > { %v1285_v29 = vrot.slane %v1284_v26, 2  ;;  %v1385_v30 = vadd.f32 %v1384_v27, %v1383_v15 }
 0x19e   : > { %v1286_v35 = vadd.f32 %v1285_v29, %v1284_v26  ;;  %v1386_v33 = vrot.slane %v1385_v30, 2 }
 0x1a0   : > { %v1287_v22 = vrot.slane %v1286_v35, 1  ;;  %v1387_v36 = vadd.f32 %v1386_v33, %v1385_v30 }
 0x1a2   : > { %v1388_v37 = vrot.slane %v1387_v36, 1  ;;  %v1288_v9 = vadd.f32 %v1287_v22, %v1286_v35 }
 0x1a4   : > { %v1389_v28 = vadd.f32 %v1388_v37, %v1387_v36 }
 0x1a6   : > { %v1391_v38 = vsel %vm1390_vm6, %v1288_v9, %v1389_v28 }
 0x1a7   : > { %1393 = vst.msk [vmem:[%s327_s19] sm:$0x3] %vm1392_vm7, %v1391_v38 }
 0x1a8 PF: > { %s15_s17 = sadd.s32 1, %s1791_s17   ;;  %s2185_s15 = smov %s1787_s16 }
 0x1a9   : > { %p12_p5 = scmp.ge.s32.totalorder %s15_s17, 4   ;;  %s2186_s16 = smov %s2188_s18 }
 0x1ab   :  { %14 = sbr.rel (!%p12_p5) target bundleno = 2 (0x2), region = 80 }

</bundles_post_ra>
